<compile_context>
chip_gen: v6e
topology: v6e:2x2x1
jax: 0.10.0
libtpu: 0.0.40
codegen_flags: <defaults>
</compile_context>

<pallas_src>
import jax
import jax.numpy as jnp
from jax.experimental import pallas as pl
from jax.experimental.pallas import tpu as pltpu

_EPS = 1e-5


def _mean_and_invstd(x):
    """x: (C, HW) f32 -> per-channel mean and 1/sqrt(biased_var + eps)."""
    inv_hw = jnp.float32(1.0 / x.shape[1])
    m = jnp.sum(x, axis=1, keepdims=True) * inv_hw            # (C, 1)
    ex2 = jnp.sum(x * x, axis=1, keepdims=True) * inv_hw      # (C, 1)
    inv_std = jax.lax.rsqrt(ex2 - m * m + jnp.float32(_EPS))  # (C, 1)
    return m, inv_std


def _cin_style_kernel(x_ref, sty_ref, ws_ref, bs_ref, wm_ref, bm_ref, o_ref):
    """One grid step = one batch sample.

    x_ref  : (C, HW)  channels on sublanes, spatial on lanes (lane-dense)
    sty_ref: (1, S)   style vector for this sample
    ws_ref : (C, S)   sig Linear weight (PyTorch (out,in) layout -> no transpose)
    bs_ref : (C, 1)   sig Linear bias
    wm_ref : (C, S)   mu Linear weight
    bm_ref : (C, 1)   mu Linear bias
    o_ref  : (C, HW)  output
    """
    x = x_ref[...]                                                         # (C, HW)
    m, inv_std = _mean_and_invstd(x)                                       # (C, 1) each

    sty = sty_ref[...]                                                     # (1, S)
    s = jnp.sum(ws_ref[...] * sty, axis=1, keepdims=True) + bs_ref[...]    # (C, 1)
    mu = jnp.sum(wm_ref[...] * sty, axis=1, keepdims=True) + bm_ref[...]   # (C, 1)

    # Fold normalization + conditional affine into one affine pass:
    #   out = s * (x - m) * inv_std + mu  ==  a * x + b
    a = s * inv_std                                                        # (C, 1)
    b = mu - a * m                                                         # (C, 1)
    o_ref[...] = (a * x + b).astype(o_ref.dtype)


def _in_kernel(x_ref, o_ref):
    """style=None path: plain InstanceNorm2d (single fused affine pass)."""
    x = x_ref[...]
    m, inv_std = _mean_and_invstd(x)
    o_ref[...] = (x * inv_std - m * inv_std).astype(o_ref.dtype)


@jax.jit
def cin_2d(x, style, ws, bs, wm, bm):
    """x: (N, C, H, W) NCHW.  style: (N, S).
    ws/wm: (C, S) (nn.Linear weight layout, out x in).  bs/bm: (C,)."""
    N, C, H, W = x.shape
    S = style.shape[1]
    HW = H * W

    x3 = x.reshape(N, C, HW).astype(jnp.float32)         # free reshape, no transpose
    sty3 = style.reshape(N, 1, S).astype(jnp.float32)
    ws2 = ws.astype(jnp.float32)
    wm2 = wm.astype(jnp.float32)
    bs2 = bs.reshape(C, 1).astype(jnp.float32)
    bm2 = bm.reshape(C, 1).astype(jnp.float32)

    out = pl.pallas_call(
        _cin_style_kernel,
        out_shape=jax.ShapeDtypeStruct((N, C, HW), jnp.float32),
        grid_spec=pltpu.PrefetchScalarGridSpec(
            num_scalar_prefetch=0,
            grid=(N,),
            in_specs=[
                pl.BlockSpec((None, C, HW), lambda n: (n, 0, 0)),   # x sample
                pl.BlockSpec((None, 1, S), lambda n: (n, 0, 0)),    # style row
                pl.BlockSpec((C, S), lambda n: (0, 0)),             # sig W
                pl.BlockSpec((C, 1), lambda n: (0, 0)),             # sig b
                pl.BlockSpec((C, S), lambda n: (0, 0)),             # mu W
                pl.BlockSpec((C, 1), lambda n: (0, 0)),             # mu b
            ],
            out_specs=pl.BlockSpec((None, C, HW), lambda n: (n, 0, 0)),
        ),
        compiler_params=pltpu.CompilerParams(
            dimension_semantics=("parallel",)),
    )(x3, sty3, ws2, bs2, wm2, bm2)

    return out.reshape(N, C, H, W)                        # free reshape back to NCHW


@jax.jit
def instance_norm_2d(x):
    """CIN_2d forward with style=None: InstanceNorm2d only."""
    N, C, H, W = x.shape
    HW = H * W
    x3 = x.reshape(N, C, HW).astype(jnp.float32)

    out = pl.pallas_call(
        _in_kernel,
        out_shape=jax.ShapeDtypeStruct((N, C, HW), jnp.float32),
        grid_spec=pltpu.PrefetchScalarGridSpec(
            num_scalar_prefetch=0,
            grid=(N,),
            in_specs=[pl.BlockSpec((None, C, HW), lambda n: (n, 0, 0))],
            out_specs=pl.BlockSpec((None, C, HW), lambda n: (n, 0, 0)),
        ),
        compiler_params=pltpu.CompilerParams(
            dimension_semantics=("parallel",)),
    )(x3)

    return out.reshape(N, C, H, W)


def _reference(x, style=None, ws=None, bs=None, wm=None, bm=None):
    """Pure-JAX reference matching torch semantics."""
    m = jnp.mean(x, axis=(2, 3), keepdims=True)
    v = jnp.mean((x - m) ** 2, axis=(2, 3), keepdims=True)
    xn = (x - m) * jax.lax.rsqrt(v + _EPS)
    if style is None:
        return xn
    s = style @ ws.T + bs
    mu = style @ wm.T + bm
    return s[:, :, None, None] * xn + mu[:, :, None, None]


if __name__ == "__main__":
    # CIN_2d(outC=4, style_dim=8); x: (2, 4, 16, 16), style: (2, 8)
    N, C, H, W, S = 2, 4, 16, 16, 8

    key = jax.random.PRNGKey(0)
    kx, ksty, kws, kbs, kwm, kbm = jax.random.split(key, 6)
    x = jax.random.normal(kx, (N, C, H, W), dtype=jnp.float32)
    style = jax.random.normal(ksty, (N, S), dtype=jnp.float32)

    # Deterministic synthetic params; shapes match nn.Linear(style_dim, outC).
    bound = 1.0 / (S ** 0.5)
    ws = jax.random.uniform(kws, (C, S), minval=-bound, maxval=bound, dtype=jnp.float32)
    bs = jax.random.uniform(kbs, (C,), minval=-bound, maxval=bound, dtype=jnp.float32)
    wm = jax.random.uniform(kwm, (C, S), minval=-bound, maxval=bound, dtype=jnp.float32)
    bm = jax.random.uniform(kbm, (C,), minval=-bound, maxval=bound, dtype=jnp.float32)

    # style path
    out = jax.block_until_ready(cin_2d(x, style, ws, bs, wm, bm))
    ref = _reference(x, style, ws, bs, wm, bm)
    assert out.shape == (N, C, H, W), out.shape
    assert jnp.allclose(out, ref, atol=1e-4, rtol=1e-4), float(jnp.max(jnp.abs(out - ref)))

    # style=None path
    out2 = jax.block_until_ready(instance_norm_2d(x))
    ref2 = _reference(x)
    assert jnp.allclose(out2, ref2, atol=1e-4, rtol=1e-4), float(jnp.max(jnp.abs(out2 - ref2)))

    print("KERNEL_OK")
</pallas_src>

<mosaic_0001>
module attributes {stable_mosaic.version = 11 : i64} {
  func.func @_cin_style_kernel(%arg0: i32, %arg1: memref<1x4x256xf32, #tpu.memory_space<vmem>>, %arg2: memref<1x1x8xf32, #tpu.memory_space<vmem>>, %arg3: memref<4x8xf32, #tpu.memory_space<vmem>>, %arg4: memref<4x1xf32, #tpu.memory_space<vmem>>, %arg5: memref<4x8xf32, #tpu.memory_space<vmem>>, %arg6: memref<4x1xf32, #tpu.memory_space<vmem>>, %arg7: memref<1x4x256xf32, #tpu.memory_space<vmem>>) attributes {dimension_semantics = [#tpu.dimension_semantics<parallel>], iteration_bounds = array<i64: 2>, scalar_prefetch = 0 : i64, scratch_operands = 0 : i64, tpu.core_type = #tpu.core_type<tc>, window_params = [{transform_indices = @transform_0, window_bounds = array<i64: 1, 4, 256>}, {transform_indices = @transform_1, window_bounds = array<i64: 1, 1, 8>}, {pipeline_mode = #tpu.pipeline_mode<synchronous>, transform_indices = @transform_2, window_bounds = array<i64: 4, 8>}, {pipeline_mode = #tpu.pipeline_mode<synchronous>, transform_indices = @transform_3, window_bounds = array<i64: 4, 1>}, {pipeline_mode = #tpu.pipeline_mode<synchronous>, transform_indices = @transform_4, window_bounds = array<i64: 4, 8>}, {pipeline_mode = #tpu.pipeline_mode<synchronous>, transform_indices = @transform_5, window_bounds = array<i64: 4, 1>}, {transform_indices = @transform_6, window_bounds = array<i64: 1, 4, 256>}]} {
    %c0 = arith.constant 0 : index
    %c0_0 = arith.constant 0 : index
    %c0_1 = arith.constant 0 : index
    %0 = vector.load %arg1[%c0, %c0_0, %c0_1] : memref<1x4x256xf32, #tpu.memory_space<vmem>>, vector<1x4x256xf32>
    %1 = vector.shape_cast %0 : vector<1x4x256xf32> to vector<4x256xf32>
    %cst = arith.constant dense<0.000000e+00> : vector<4xf32>
    %2 = vector.multi_reduction <add>, %1, %cst [1] : vector<4x256xf32> to vector<4xf32>
    %3 = vector.shape_cast %2 : vector<4xf32> to vector<4x1xf32>
    %cst_2 = arith.constant 3.906250e-03 : f32
    %4 = vector.broadcast %cst_2 : f32 to vector<4x1xf32>
    %5 = arith.mulf %3, %4 : vector<4x1xf32>
    %6 = arith.mulf %1, %1 : vector<4x256xf32>
    %cst_3 = arith.constant dense<0.000000e+00> : vector<4xf32>
    %7 = vector.multi_reduction <add>, %6, %cst_3 [1] : vector<4x256xf32> to vector<4xf32>
    %8 = vector.shape_cast %7 : vector<4xf32> to vector<4x1xf32>
    %cst_4 = arith.constant 3.906250e-03 : f32
    %9 = vector.broadcast %cst_4 : f32 to vector<4x1xf32>
    %10 = arith.mulf %8, %9 : vector<4x1xf32>
    %11 = arith.mulf %5, %5 : vector<4x1xf32>
    %12 = arith.subf %10, %11 : vector<4x1xf32>
    %cst_5 = arith.constant 9.99999974E-6 : f32
    %13 = vector.broadcast %cst_5 : f32 to vector<4x1xf32>
    %14 = arith.addf %12, %13 : vector<4x1xf32>
    %15 = math.rsqrt %14 : vector<4x1xf32>
    %c0_6 = arith.constant 0 : index
    %c0_7 = arith.constant 0 : index
    %c0_8 = arith.constant 0 : index
    %16 = vector.load %arg2[%c0_6, %c0_7, %c0_8] : memref<1x1x8xf32, #tpu.memory_space<vmem>>, vector<1x1x8xf32>
    %17 = vector.shape_cast %16 : vector<1x1x8xf32> to vector<1x8xf32>
    %c0_9 = arith.constant 0 : index
    %c0_10 = arith.constant 0 : index
    %18 = vector.load %arg3[%c0_9, %c0_10] : memref<4x8xf32, #tpu.memory_space<vmem>>, vector<4x8xf32>
    %19 = vector.broadcast %17 : vector<1x8xf32> to vector<4x8xf32>
    %20 = arith.mulf %18, %19 : vector<4x8xf32>
    %cst_11 = arith.constant dense<0.000000e+00> : vector<4xf32>
    %21 = vector.multi_reduction <add>, %20, %cst_11 [1] : vector<4x8xf32> to vector<4xf32>
    %22 = vector.shape_cast %21 : vector<4xf32> to vector<4x1xf32>
    %c0_12 = arith.constant 0 : index
    %c0_13 = arith.constant 0 : index
    %23 = vector.load %arg4[%c0_12, %c0_13] : memref<4x1xf32, #tpu.memory_space<vmem>>, vector<4x1xf32>
    %24 = arith.addf %22, %23 : vector<4x1xf32>
    %c0_14 = arith.constant 0 : index
    %c0_15 = arith.constant 0 : index
    %25 = vector.load %arg5[%c0_14, %c0_15] : memref<4x8xf32, #tpu.memory_space<vmem>>, vector<4x8xf32>
    %26 = vector.broadcast %17 : vector<1x8xf32> to vector<4x8xf32>
    %27 = arith.mulf %25, %26 : vector<4x8xf32>
    %cst_16 = arith.constant dense<0.000000e+00> : vector<4xf32>
    %28 = vector.multi_reduction <add>, %27, %cst_16 [1] : vector<4x8xf32> to vector<4xf32>
    %29 = vector.shape_cast %28 : vector<4xf32> to vector<4x1xf32>
    %c0_17 = arith.constant 0 : index
    %c0_18 = arith.constant 0 : index
    %30 = vector.load %arg6[%c0_17, %c0_18] : memref<4x1xf32, #tpu.memory_space<vmem>>, vector<4x1xf32>
    %31 = arith.addf %29, %30 : vector<4x1xf32>
    %32 = arith.mulf %24, %15 : vector<4x1xf32>
    %33 = arith.mulf %32, %5 : vector<4x1xf32>
    %34 = arith.subf %31, %33 : vector<4x1xf32>
    %35 = vector.broadcast %32 : vector<4x1xf32> to vector<4x256xf32>
    %36 = arith.mulf %35, %1 : vector<4x256xf32>
    %37 = vector.broadcast %34 : vector<4x1xf32> to vector<4x256xf32>
    %38 = arith.addf %36, %37 : vector<4x256xf32>
    %c0_19 = arith.constant 0 : index
    %c0_20 = arith.constant 0 : index
    %c0_21 = arith.constant 0 : index
    %39 = vector.load %arg7[%c0_19, %c0_20, %c0_21] : memref<1x4x256xf32, #tpu.memory_space<vmem>>, vector<1x4x256xf32>
    %40 = vector.shape_cast %39 : vector<1x4x256xf32> to vector<4x256xf32>
    %41 = vector.shape_cast %38 : vector<4x256xf32> to vector<1x4x256xf32>
    tpu.vector_store %arg7[%c0_19, %c0_20, %c0_21], %41 {strides = array<i32>} : memref<1x4x256xf32, #tpu.memory_space<vmem>>, vector<1x4x256xf32>,
    return
  }
  func.func @transform_0(%arg0: i32) -> (i32, i32, i32) {
    %c0_i32 = arith.constant 0 : i32
    %c0_i32_0 = arith.constant 0 : i32
    %c0_i32_1 = arith.constant 0 : i32
    return %arg0, %c0_i32, %c0_i32_0 : i32, i32, i32
  }
  func.func @transform_1(%arg0: i32) -> (i32, i32, i32) {
    %c0_i32 = arith.constant 0 : i32
    %c0_i32_0 = arith.constant 0 : i32
    %c0_i32_1 = arith.constant 0 : i32
    return %arg0, %c0_i32, %c0_i32_0 : i32, i32, i32
  }
  func.func @transform_2(%arg0: i32) -> (i32, i32) {
    %c0_i32 = arith.constant 0 : i32
    %c0_i32_0 = arith.constant 0 : i32
    %c0_i32_1 = arith.constant 0 : i32
    return %c0_i32, %c0_i32_0 : i32, i32
  }
  func.func @transform_3(%arg0: i32) -> (i32, i32) {
    %c0_i32 = arith.constant 0 : i32
    %c0_i32_0 = arith.constant 0 : i32
    %c0_i32_1 = arith.constant 0 : i32
    return %c0_i32, %c0_i32_0 : i32, i32
  }
  func.func @transform_4(%arg0: i32) -> (i32, i32) {
    %c0_i32 = arith.constant 0 : i32
    %c0_i32_0 = arith.constant 0 : i32
    %c0_i32_1 = arith.constant 0 : i32
    return %c0_i32, %c0_i32_0 : i32, i32
  }
  func.func @transform_5(%arg0: i32) -> (i32, i32) {
    %c0_i32 = arith.constant 0 : i32
    %c0_i32_0 = arith.constant 0 : i32
    %c0_i32_1 = arith.constant 0 : i32
    return %c0_i32, %c0_i32_0 : i32, i32
  }
  func.func @transform_6(%arg0: i32) -> (i32, i32, i32) {
    %c0_i32 = arith.constant 0 : i32
    %c0_i32_0 = arith.constant 0 : i32
    %c0_i32_1 = arith.constant 0 : i32
    return %arg0, %c0_i32, %c0_i32_0 : i32, i32, i32
  }
}

</mosaic_0001>

<bundles_post_ra>
// kernel: cin_2d.1
= control target key start
LH: loop header
LB: loop body
LE: loop exit
PB: predicated region body
PF: predicated region fallthrough
CT: control target
= control target key end

     0   :  { %s471_s21 = smov 0   ;;  %s515_s0 = inlined_call_operand.vmem [shape: f32[2,4,256], index: 0, kind: input, shape index: {}]   ;;  %s516_s1 = inlined_call_operand.vmem [shape: f32[2,1,8], index: 1, kind: input, shape index: {}]   ;;  %s517_s2 = inlined_call_operand.vmem [shape: f32[4,8], index: 2, kind: input, shape index: {}]   ;;  %s518_s3 = inlined_call_operand.vmem [shape: f32[4,1], index: 3, kind: input, shape index: {}]   ;;  %s519_s4 = inlined_call_operand.vmem [shape: f32[4,8], index: 4, kind: input, shape index: {}]   ;;  %s520_s5 = inlined_call_operand.vmem [shape: f32[4,1], index: 5, kind: input, shape index: {}]   ;;  %s521_s6 = inlined_call_operand.vmem [shape: f32[2,4,256], index: 6, kind: output, shape index: {}]  }
   0x1 LB: > { %s399_s22 = sadd.s32 4294967295, %s433_s21   ;;  %p403_p0 = scmp.ge.s32.totalorder %s433_s21, 1  ;;  %s433_s21 = sphi %s471_s21, %s16_s21  }
   0x2   : > { %p220_p1 = scmp.lt.s32.totalorder %s433_s21, 3 }
   0x4   : > { %p221_p2 = pnand %p403_p0, %p220_p1 }
   0x5   : > { %p253_p3 = scmp.lt.s32.totalorder (!%p221_p2), %s399_s22, 1 }
   0x6   : > { %224 = sbr.rel (%p221_p2) target bundleno = 317 (0x13d), region = 44 }
   0xb   : > { %s523_s22 = smov (!%p253_p3, %s399_s22), 1  ;;  %v292_v0 = vld [vmem:[%s517_s2] sm:$0xf]  ;;  %vm270_vm0 = vcmask 1043456   ;;  %vm300_vm1 = vcmask 60416   ;;  %v435_v17 = vmov 0  }
   0xc   : > { %v306_v1 = vld [vmem:[%s519_s4] sm:$0xf]  ;;  %s411_s27 = sshll.u32 %s523_s22, 3  ;;  %s260_s30 = scalar_lea.vmem %s516_s1, %s523_s22  ;;  %422 = vset.pattern.permute.xlu0 %v435_v17  ;;  %423 = vset.pattern.permute.xlu1 %v435_v17 }
   0xd   : > { %s257_s9 = scalar_lea.vmem %s515_s0, %s411_s27  ;;  %v408_v2 = vld [vmem:[%s260_s30] ss:$0 sm:$0xff]  ;;  %s265_s16 = scalar_lea.vmem %s521_s6, %s411_s27 }
   0xe   : > { %v266_v3 = vld [vmem:[%s257_s9] sm:$0xff]  ;;  %v299_v4 = vmul.f32 %v408_v2, %v292_v0  ;;  %v307_v5 = vmul.f32 %v408_v2, %v306_v1 }
   0xf   : > { %v268_v6 = vcombine.high %v266_v3, %v266_v3  ;;  %v271_v7 = vsel %vm270_vm0, %v266_v3, 0.0  ;;  %v277_v8 = vmul.f32 %v266_v3, %v266_v3  ;;  %v304_v26 = vld [vmem:[%s518_s3] sm:$0xf] }
  0x10   : > { %v301_v9 = vsel %vm300_vm1, %v299_v4, 0.0  ;;  %v308_v14 = vsel %vm300_vm1, %v307_v5, 0.0  ;;  %v311_v28 = vld [vmem:[%s520_s5] sm:$0xf] }
  0x11   : > { %v272_v10 = vsel %vm270_vm0, %v268_v6, 0.0  ;;  %v279_v11 = vcombine.high %v277_v8, %v277_v8  ;;  %v281_v12 = vsel %vm270_vm0, %v277_v8, 0.0  ;;  %302 = vadd.xlane.f32.xlu1 %v301_v9 }
  0x12   : > { %v273_v13 = vadd.f32 %v272_v10, %v271_v7 }
  0x13   : > { %v282_v15 = vsel %vm270_vm0, %v279_v11, 0.0 }
  0x14   : > { %274 = vadd.xlane.f32.xlu0 %v273_v13  ;;  %v283_v16 = vadd.f32 %v282_v15, %v281_v12 }
  0x15   : > { %309 = vadd.xlane.f32.xlu1 %v308_v14 }
  0x18   : > { %284 = vadd.xlane.f32.xlu0 %v283_v16 }
  0x9a   : > { %v303_v25 = vpop.xlane.xlu1 %302 }
  0x9b   : > { %v305_v27 = vadd.f32 %v304_v26, %v303_v25 }
  0x9d   : > { %v275_v18 = vpop.xlane.xlu0 %274 }
  0x9e   : > { %v276_v19 = vmul.f32 0.00390625, %v275_v18  ;;  %v310_v29 = vpop.xlane.xlu1 %309 }
  0x9f   : > { %v312_v32 = vadd.f32 %v311_v28, %v310_v29 }
  0xa0   : > { %v287_v21 = vmul.f32 %v276_v19, %v276_v19 }
  0xa1   : > { %v285_v20 = vpop.xlane.xlu0 %284 }
  0xa2   : > { %v286_v22 = vmul.f32 0.00390625, %v285_v20 }
  0xa4   : > { %v288_v23 = vsub.f32 %v286_v22, %v287_v21 }
  0xa6   : > { %v289_v24 = vadd.f32 1e-05, %v288_v23 }
  0xa8   : > { %425 = vrsqrt.f32 %v289_v24 }
  0xb5   : > { %v426_v30 = vpop.eup %425 }
  0xb6   : > { %v313_v31 = vmul.f32 %v426_v30, %v305_v27 }
  0xb8   : > { %v314_v33 = vmul.f32 %v313_v31, %v276_v19  ;;  %318 = vperm.xlu0 %422, %v313_v31  }
  0xba   : > { %v315_v34 = vsub.f32 %v312_v32, %v314_v33 }
  0xbc   : > { %325 = vperm.xlu1 %423, %v315_v34  }
 0x133   : > { %v319_v35 = vpop.permute.xlu0 %318 }
 0x134   : > { %v321_v36 = vmul.f32 %v319_v35, %v266_v3  ;;  %v322_v37 = vmul.f32 %v319_v35, %v268_v6 }
 0x137   : > { %v326_v38 = vpop.permute.xlu1 %325 }
 0x138   : > { %v328_v39 = vadd.f32 %v326_v38, %v321_v36  ;;  %v329_v40 = vadd.f32 %v326_v38, %v322_v37 }
 0x13a   : > { %v332_v41 = vcombine.low %v328_v39, %v329_v40 }
 0x13c   : > { %334 = vst [vmem:[%s265_s16] sm:$0xff] %v332_v41 }
 0x13d PF: > { %s16_s21 = sadd.s32 1, %s433_s21  }
 0x13e   : > { %p13_p4 = scmp.ge.s32.totalorder %s16_s21, 4  }
 0x140   :  { %15 = sbr.rel (!%p13_p4) target bundleno = 1 (0x1), region = 77 }

</bundles_post_ra>
